<compile_context>
chip_gen: v5e
topology: v5e:2x2
jax: 0.10.0
libtpu: 0.0.40
codegen_flags: <defaults>
</compile_context>

<pallas_src>
import functools

import jax
import jax.numpy as jnp
from jax.experimental import pallas as pl
from jax.experimental.pallas import tpu as pltpu

TK_CAP = 4096     # K-tile cap: bf16 W1 slice <= 2 MiB per buffer (v7x-safe)
TB_CAP = 256      # batch-tile cap (matches v6e/v7x 256x256 MXU)
D1 = 256          # layer-1 width
D2 = 64           # layer-2 logical width
D2_PAD = 128      # layer-2 padded (lane-dense) width


def _round_up(x, m):
    return ((x + m - 1) // m) * m


def vae_encoder_kernel(x_ref, w1_ref, b1_ref, w2_ref, b2_ref, w3_ref, b3_ref,
                       o_ref, acc_ref):
    # grid = (batch_blocks, k_blocks); K is the innermost ("arbitrary") axis.
    k = pl.program_id(1)

    @pl.when(k == 0)
    def _():
        acc_ref[...] = jnp.zeros_like(acc_ref)

    # Streamed layer-1 partial product. Both operands bf16 -> native bf16 MXU
    # path; f32 accumulation lives in the VMEM scratch.
    acc_ref[...] += jnp.dot(x_ref[...], w1_ref[...],
                            preferred_element_type=jnp.float32)

    @pl.when(k == pl.num_programs(1) - 1)
    def _():
        # Layer 1 bias + ReLU (f32 on the VPU, tiny epilogue work).
        h1 = jnp.maximum(acc_ref[...] + b1_ref[...], 0.0)

        # Layer 2: (tb,256) @ (256,128 padded). Padded cols of W2/b2 are zero,
        # so padded lanes of h2 stay exactly zero through the ReLU.
        h2 = jnp.dot(h1.astype(jnp.bfloat16), w2_ref[...],
                     preferred_element_type=jnp.float32)
        h2 = jnp.maximum(h2 + b2_ref[...], 0.0)

        # Layer 3: (tb,128) @ (128,h_pad). Padded rows of W3 are zero.
        h3 = jnp.dot(h2.astype(jnp.bfloat16), w3_ref[...],
                     preferred_element_type=jnp.float32)
        o_ref[...] = (h3 + b3_ref[...]).astype(o_ref.dtype)


def prepare_params(params, input_dim, num_hidden):
    """One-time padding + bf16 cast of the weights (hoisted out of forward)."""
    w1, b1, w2, b2, w3, b3 = params

    tk = min(TK_CAP, _round_up(input_dim, 128))
    k_pad = _round_up(input_dim, tk)        # tk divides k_pad by construction
    h_pad = _round_up(num_hidden, 128)      # lane-dense output stores

    w1_p = (jnp.zeros((k_pad, D1), jnp.bfloat16)
            .at[:input_dim, :].set(w1.astype(jnp.bfloat16)))
    b1_p = jnp.asarray(b1, jnp.float32).reshape(1, D1)

    w2_p = (jnp.zeros((D1, D2_PAD), jnp.bfloat16)
            .at[:, :D2].set(w2.astype(jnp.bfloat16)))
    b2_p = (jnp.zeros((1, D2_PAD), jnp.float32)
            .at[:, :D2].set(jnp.asarray(b2, jnp.float32).reshape(1, D2)))

    w3_p = (jnp.zeros((D2_PAD, h_pad), jnp.bfloat16)
            .at[:D2, :num_hidden].set(w3.astype(jnp.bfloat16)))
    b3_p = (jnp.zeros((1, h_pad), jnp.float32)
            .at[:, :num_hidden].set(jnp.asarray(b3, jnp.float32)
                                    .reshape(1, num_hidden)))
    return (w1_p, b1_p, w2_p, b2_p, w3_p, b3_p)


def vae_encoder_forward(x_nchw, prepared, num_hidden):
    """x_nchw: (B, C, H, W). Returns (B, num_hidden) float32."""
    w1_p, b1_p, w2_p, b2_p, w3_p, b3_p = prepared
    B = x_nchw.shape[0]
    k_pad, _ = w1_p.shape
    _, h_pad = w3_p.shape

    # nn.Flatten(): (B, C, H, W) -> (B, C*H*W), row-major like PyTorch.
    x2d = x_nchw.reshape(B, -1)
    input_dim = x2d.shape[1]

    # --- Tiling (static) -------------------------------------------------
    tk = min(TK_CAP, k_pad)                 # divides k_pad (see prepare_params)
    tb = min(TB_CAP, _round_up(B, 16))      # bf16-friendly sublane count
    b_pad = _round_up(B, tb)
    n_kb = k_pad // tk

    # Only x is padded/cast per call (zeros contribute nothing to the dots);
    # streaming it in bf16 halves its DMA traffic.
    x_p = (jnp.zeros((b_pad, k_pad), jnp.bfloat16)
           .at[:B, :input_dim].set(x2d.astype(jnp.bfloat16)))

    # Deeper buffering on the streamed operands only if the K loop is long
    # enough for exposed DMA to matter.
    def stream_spec(shape, index_map):
        if n_kb >= 4:
            return pl.BlockSpec(shape, index_map, pipeline_mode=pl.Buffered(3))
        return pl.BlockSpec(shape, index_map)

    grid = (b_pad // tb, n_kb)

    flops = 2 * b_pad * (k_pad * D1 + D1 * D2_PAD + D2_PAD * h_pad)
    bytes_accessed = (x_p.size * 2                       # bf16 x
                      + (b_pad // tb) * k_pad * D1 * 2   # bf16 W1 per batch blk
                      + w2_p.size * 2 + w3_p.size * 2
                      + (b1_p.size + b2_p.size + b3_p.size) * 4
                      + b_pad * h_pad * 4)               # f32 output

    out = pl.pallas_call(
        vae_encoder_kernel,
        out_shape=jax.ShapeDtypeStruct((b_pad, h_pad), jnp.float32),
        grid_spec=pltpu.PrefetchScalarGridSpec(
            num_scalar_prefetch=0,
            grid=grid,
            in_specs=[
                stream_spec((tb, tk), lambda b, k: (b, k)),      # x  (streamed)
                stream_spec((tk, D1), lambda b, k: (k, 0)),      # W1 (streamed)
                pl.BlockSpec((1, D1), lambda b, k: (0, 0)),      # b1 (resident)
                pl.BlockSpec((D1, D2_PAD), lambda b, k: (0, 0)), # W2 (resident)
                pl.BlockSpec((1, D2_PAD), lambda b, k: (0, 0)),  # b2 (resident)
                pl.BlockSpec((D2_PAD, h_pad), lambda b, k: (0, 0)),  # W3
                pl.BlockSpec((1, h_pad), lambda b, k: (0, 0)),   # b3 (resident)
            ],
            out_specs=pl.BlockSpec((tb, h_pad), lambda b, k: (b, 0)),
            scratch_shapes=[pltpu.VMEM((tb, D1), jnp.float32)],  # layer-1 acc
        ),
        compiler_params=pltpu.CompilerParams(
            dimension_semantics=("parallel", "arbitrary")),
        cost_estimate=pl.CostEstimate(flops=flops, transcendentals=0,
                                      bytes_accessed=bytes_accessed),
    )(x_p, w1_p, b1_p, w2_p, b2_p, w3_p, b3_p)

    return out[:B, :num_hidden]


def init_params(key, input_dim, num_hidden):
    """Deterministic synthetic params. Weights (in, out) in bf16, biases f32."""
    ks = jax.random.split(key, 6)

    def lin(kw, kb, fan_in, fan_out):
        # PyTorch default init: U(-1/sqrt(fan_in), 1/sqrt(fan_in))
        bound = 1.0 / jnp.sqrt(fan_in)
        w = jax.random.uniform(kw, (fan_in, fan_out), jnp.float32, -bound, bound)
        b = jax.random.uniform(kb, (1, fan_out), jnp.float32, -bound, bound)
        return w.astype(jnp.bfloat16), b

    w1, b1 = lin(ks[0], ks[1], input_dim, 256)
    w2, b2 = lin(ks[2], ks[3], 256, 64)
    w3, b3 = lin(ks[4], ks[5], 64, num_hidden)
    return (w1, b1, w2, b2, w3, b3)


def reference_forward(x_nchw, params):
    """Pure-JAX f32 reference mirroring the PyTorch module (bf16 weights)."""
    w1, b1, w2, b2, w3, b3 = params
    x = x_nchw.reshape(x_nchw.shape[0], -1).astype(jnp.float32)
    x = jnp.maximum(x @ w1.astype(jnp.float32) + b1, 0.0)
    x = jnp.maximum(x @ w2.astype(jnp.float32) + b2, 0.0)
    return x @ w3.astype(jnp.float32) + b3


if __name__ == "__main__":
    key = jax.random.PRNGKey(0)
    k_x, k_p = jax.random.split(key)

    B, C, H, W = 2, 4, 16, 16          # input_dim = C*H*W = 1024
    input_dim = C * H * W
    num_hidden = 2

    x = jax.random.normal(k_x, (B, C, H, W), jnp.float32)
    params = init_params(k_p, input_dim, num_hidden)

    # One-time weight padding / bf16 packing (outside jit, amortized).
    prepared = prepare_params(params, input_dim, num_hidden)

    fwd = jax.jit(functools.partial(vae_encoder_forward, num_hidden=num_hidden))
    out = jax.block_until_ready(fwd(x, prepared))

    ref = reference_forward(x, params)
    assert out.shape == (B, num_hidden)
    # bf16 activations feeding the MXU (f32 accumulate) vs. f32 reference:
    # documented precision contract, hence the 1e-2 tolerance.
    assert jnp.allclose(out, ref, atol=1e-2, rtol=1e-2), "mismatch vs reference"

    print("KERNEL_OK")
</pallas_src>

<mosaic_0001>
module attributes {stable_mosaic.version = 11 : i64} {
  func.func @vae_encoder_kernel(%arg0: i32, %arg1: i32, %arg2: memref<16x1024xbf16, #tpu.memory_space<vmem>>, %arg3: memref<1024x256xbf16, #tpu.memory_space<vmem>>, %arg4: memref<1x256xf32, #tpu.memory_space<vmem>>, %arg5: memref<256x128xbf16, #tpu.memory_space<vmem>>, %arg6: memref<1x128xf32, #tpu.memory_space<vmem>>, %arg7: memref<128x128xbf16, #tpu.memory_space<vmem>>, %arg8: memref<1x128xf32, #tpu.memory_space<vmem>>, %arg9: memref<16x128xf32, #tpu.memory_space<vmem>>, %arg10: memref<16x256xf32, #tpu.memory_space<vmem>>) attributes {dimension_semantics = [#tpu.dimension_semantics<parallel>, #tpu.dimension_semantics<arbitrary>], iteration_bounds = array<i64: 1, 1>, scalar_prefetch = 0 : i64, scratch_operands = 1 : i64, tpu.core_type = #tpu.core_type<tc>, window_params = [{transform_indices = @transform_0, window_bounds = array<i64: 16, 1024>}, {transform_indices = @transform_1, window_bounds = array<i64: 1024, 256>}, {pipeline_mode = #tpu.pipeline_mode<synchronous>, transform_indices = @transform_2, window_bounds = array<i64: 1, 256>}, {pipeline_mode = #tpu.pipeline_mode<synchronous>, transform_indices = @transform_3, window_bounds = array<i64: 256, 128>}, {pipeline_mode = #tpu.pipeline_mode<synchronous>, transform_indices = @transform_4, window_bounds = array<i64: 1, 128>}, {pipeline_mode = #tpu.pipeline_mode<synchronous>, transform_indices = @transform_5, window_bounds = array<i64: 128, 128>}, {pipeline_mode = #tpu.pipeline_mode<synchronous>, transform_indices = @transform_6, window_bounds = array<i64: 1, 128>}, {transform_indices = @transform_7, window_bounds = array<i64: 16, 128>}]} {
    %c0_i32 = arith.constant 0 : i32
    %0 = arith.cmpi eq, %arg1, %c0_i32 : i32
    %1 = arith.extui %0 : i1 to i32
    %c0_i32_0 = arith.constant 0 : i32
    %2 = arith.cmpi ne, %1, %c0_i32_0 : i32
    scf.if %2 {
      %cst_10 = arith.constant 0.000000e+00 : f32
      %12 = vector.broadcast %cst_10 : f32 to vector<16x256xf32>
      %c0_11 = arith.constant 0 : index
      %c0_12 = arith.constant 0 : index
      %13 = vector.load %arg10[%c0_11, %c0_12] : memref<16x256xf32, #tpu.memory_space<vmem>>, vector<16x256xf32>
      tpu.vector_store %arg10[%c0_11, %c0_12], %12 {strides = array<i32>} : memref<16x256xf32, #tpu.memory_space<vmem>>, vector<16x256xf32>,
    } else {
    }
    %c0 = arith.constant 0 : index
    %c0_1 = arith.constant 0 : index
    %3 = vector.load %arg10[%c0, %c0_1] : memref<16x256xf32, #tpu.memory_space<vmem>>, vector<16x256xf32>
    %c0_2 = arith.constant 0 : index
    %c0_3 = arith.constant 0 : index
    %4 = vector.load %arg2[%c0_2, %c0_3] : memref<16x1024xbf16, #tpu.memory_space<vmem>>, vector<16x1024xbf16>
    %c0_4 = arith.constant 0 : index
    %c0_5 = arith.constant 0 : index
    %5 = vector.load %arg3[%c0_4, %c0_5] : memref<1024x256xbf16, #tpu.memory_space<vmem>>, vector<1024x256xbf16>
    %cst = arith.constant dense<0.000000e+00> : vector<16x256xf32>
    %6 = tpu.matmul %4, %5, %cst {dimension_numbers = #tpu.dot_dimension_numbers<[1], [0], [0], [1], [0, 0, 1, 1], [], []>} : vector<16x1024xbf16>, vector<1024x256xbf16>, vector<16x256xf32> -> vector<16x256xf32>
    %7 = arith.addf %3, %6 : vector<16x256xf32>
    %c0_6 = arith.constant 0 : index
    %c0_7 = arith.constant 0 : index
    %8 = vector.load %arg10[%c0_6, %c0_7] : memref<16x256xf32, #tpu.memory_space<vmem>>, vector<16x256xf32>
    tpu.vector_store %arg10[%c0_6, %c0_7], %7 {strides = array<i32>} : memref<16x256xf32, #tpu.memory_space<vmem>>, vector<16x256xf32>,
    %c0_i32_8 = arith.constant 0 : i32
    %9 = arith.cmpi eq, %arg1, %c0_i32_8 : i32
    %10 = arith.extui %9 : i1 to i32
    %c0_i32_9 = arith.constant 0 : i32
    %11 = arith.cmpi ne, %10, %c0_i32_9 : i32
    scf.if %11 {
      %c0_10 = arith.constant 0 : index
      %c0_11 = arith.constant 0 : index
      %12 = vector.load %arg10[%c0_10, %c0_11] : memref<16x256xf32, #tpu.memory_space<vmem>>, vector<16x256xf32>
      %c0_12 = arith.constant 0 : index
      %c0_13 = arith.constant 0 : index
      %13 = vector.load %arg4[%c0_12, %c0_13] : memref<1x256xf32, #tpu.memory_space<vmem>>, vector<1x256xf32>
      %14 = vector.broadcast %13 : vector<1x256xf32> to vector<16x256xf32>
      %15 = arith.addf %12, %14 : vector<16x256xf32>
      %cst_14 = arith.constant 0.000000e+00 : f32
      %16 = vector.broadcast %cst_14 : f32 to vector<16x256xf32>
      %17 = arith.maximumf %15, %16 : vector<16x256xf32>
      %18 = arith.truncf %17 : vector<16x256xf32> to vector<16x256xbf16>
      %c0_15 = arith.constant 0 : index
      %c0_16 = arith.constant 0 : index
      %19 = vector.load %arg5[%c0_15, %c0_16] : memref<256x128xbf16, #tpu.memory_space<vmem>>, vector<256x128xbf16>
      %cst_17 = arith.constant dense<0.000000e+00> : vector<16x128xf32>
      %20 = tpu.matmul %18, %19, %cst_17 {dimension_numbers = #tpu.dot_dimension_numbers<[1], [0], [0], [1], [0, 0, 1, 1], [], []>} : vector<16x256xbf16>, vector<256x128xbf16>, vector<16x128xf32> -> vector<16x128xf32>
      %c0_18 = arith.constant 0 : index
      %c0_19 = arith.constant 0 : index
      %21 = vector.load %arg6[%c0_18, %c0_19] : memref<1x128xf32, #tpu.memory_space<vmem>>, vector<1x128xf32>
      %22 = vector.broadcast %21 : vector<1x128xf32> to vector<16x128xf32>
      %23 = arith.addf %20, %22 : vector<16x128xf32>
      %cst_20 = arith.constant 0.000000e+00 : f32
      %24 = vector.broadcast %cst_20 : f32 to vector<16x128xf32>
      %25 = arith.maximumf %23, %24 : vector<16x128xf32>
      %26 = arith.truncf %25 : vector<16x128xf32> to vector<16x128xbf16>
      %c0_21 = arith.constant 0 : index
      %c0_22 = arith.constant 0 : index
      %27 = vector.load %arg7[%c0_21, %c0_22] : memref<128x128xbf16, #tpu.memory_space<vmem>>, vector<128x128xbf16>
      %cst_23 = arith.constant dense<0.000000e+00> : vector<16x128xf32>
      %28 = tpu.matmul %26, %27, %cst_23 {dimension_numbers = #tpu.dot_dimension_numbers<[1], [0], [0], [1], [0, 0, 1, 1], [], []>} : vector<16x128xbf16>, vector<128x128xbf16>, vector<16x128xf32> -> vector<16x128xf32>
      %c0_24 = arith.constant 0 : index
      %c0_25 = arith.constant 0 : index
      %29 = vector.load %arg8[%c0_24, %c0_25] : memref<1x128xf32, #tpu.memory_space<vmem>>, vector<1x128xf32>
      %30 = vector.broadcast %29 : vector<1x128xf32> to vector<16x128xf32>
      %31 = arith.addf %28, %30 : vector<16x128xf32>
      %c0_26 = arith.constant 0 : index
      %c0_27 = arith.constant 0 : index
      %32 = vector.load %arg9[%c0_26, %c0_27] : memref<16x128xf32, #tpu.memory_space<vmem>>, vector<16x128xf32>
      tpu.vector_store %arg9[%c0_26, %c0_27], %31 {strides = array<i32>} : memref<16x128xf32, #tpu.memory_space<vmem>>, vector<16x128xf32>,
    } else {
    }
    return
  }
  func.func @transform_0(%arg0: i32, %arg1: i32) -> (i32, i32) {
    %c0_i32 = arith.constant 0 : i32
    return %arg0, %arg1 : i32, i32
  }
  func.func @transform_1(%arg0: i32, %arg1: i32) -> (i32, i32) {
    %c0_i32 = arith.constant 0 : i32
    %c0_i32_0 = arith.constant 0 : i32
    return %arg1, %c0_i32 : i32, i32
  }
  func.func @transform_2(%arg0: i32, %arg1: i32) -> (i32, i32) {
    %c0_i32 = arith.constant 0 : i32
    %c0_i32_0 = arith.constant 0 : i32
    %c0_i32_1 = arith.constant 0 : i32
    return %c0_i32, %c0_i32_0 : i32, i32
  }
  func.func @transform_3(%arg0: i32, %arg1: i32) -> (i32, i32) {
    %c0_i32 = arith.constant 0 : i32
    %c0_i32_0 = arith.constant 0 : i32
    %c0_i32_1 = arith.constant 0 : i32
    return %c0_i32, %c0_i32_0 : i32, i32
  }
  func.func @transform_4(%arg0: i32, %arg1: i32) -> (i32, i32) {
    %c0_i32 = arith.constant 0 : i32
    %c0_i32_0 = arith.constant 0 : i32
    %c0_i32_1 = arith.constant 0 : i32
    return %c0_i32, %c0_i32_0 : i32, i32
  }
  func.func @transform_5(%arg0: i32, %arg1: i32) -> (i32, i32) {
    %c0_i32 = arith.constant 0 : i32
    %c0_i32_0 = arith.constant 0 : i32
    %c0_i32_1 = arith.constant 0 : i32
    return %c0_i32, %c0_i32_0 : i32, i32
  }
  func.func @transform_6(%arg0: i32, %arg1: i32) -> (i32, i32) {
    %c0_i32 = arith.constant 0 : i32
    %c0_i32_0 = arith.constant 0 : i32
    %c0_i32_1 = arith.constant 0 : i32
    return %c0_i32, %c0_i32_0 : i32, i32
  }
  func.func @transform_7(%arg0: i32, %arg1: i32) -> (i32, i32) {
    %c0_i32 = arith.constant 0 : i32
    %c0_i32_0 = arith.constant 0 : i32
    return %arg0, %c0_i32 : i32, i32
  }
}

</mosaic_0001>

<bundles_post_ra>
// kernel: vae_encoder_forward.1
= control target key start
LH: loop header
LB: loop body
LE: loop exit
PB: predicated region body
PF: predicated region fallthrough
CT: control target
= control target key end

     0   :  { %12 = vsyncpa [#allocation4], 0  ;;  %s2208_s27 = smov [#allocation3]   ;;  %s2209_s29 = smov 128   ;;  %s2425_s0 = inlined_call_operand.vmem [shape: bf16[16,1024], index: 0, kind: input, shape index: {}]   ;;  %s2426_s1 = inlined_call_operand.hbm [shape: bf16[1024,256], index: 1, kind: input, shape index: {}]   ;;  %s2427_s2 = inlined_call_operand.vmem [shape: f32[1,256], index: 2, kind: input, shape index: {}]   ;;  %s2428_s3 = inlined_call_operand.vmem [shape: bf16[256,128], index: 3, kind: input, shape index: {}]   ;;  %s2429_s4 = inlined_call_operand.vmem [shape: f32[1,128], index: 4, kind: input, shape index: {}]   ;;  %s2430_s5 = inlined_call_operand.vmem [shape: bf16[128,128], index: 5, kind: input, shape index: {}]   ;;  %s2431_s6 = inlined_call_operand.vmem [shape: f32[1,128], index: 6, kind: input, shape index: {}]   ;;  %s2432_s7 = inlined_call_operand.vmem [shape: f32[16,128], index: 7, kind: output, shape index: {}]  }
   0x1   :  { %s19_s26 = sshll.u32 %s2426_s1, 4  ;;  %s21_s28 = sshll.u32 %s2208_s27, 4  ;;  %s20_s26 = int_to_ptr.hbm [resolvable:$true] %s19_s26  ;;  %s22_s28 = int_to_ptr.vmem [resolvable:$true] %s21_s28 }
   0x2   :  { %s2210_s30 = smov 8  }
   0x3   :  { %27 = dma.hbm_to_vmem [thread:$0]  %s20_s26, 16384, %s22_s28, [#allocation4], %s2209_s29, %s2209_s29, %s2210_s30  }
   0x4   :  { %2206 = dma.done.wait [#allocation4], 16384  }
   0x5   :  { %2207 = vsyncadd [#allocation4], 4294950912  ;;  %v1467_v0 = vld [vmem:[#allocation3 + $0x70] sm:$0xf]  ;;  %v2040_v1 = vld [vmem:[#allocation3 + $0x74] sm:$0xf0] }
   0x6   :  { %v1531_v2 = vld [vmem:[#allocation3 + $0xf0] sm:$0xf]  ;;  %v1468_v3 = vor.u32 %v2040_v1, %v1467_v0  ;;  %v2056_v4 = vld [vmem:[#allocation3 + $0xf4] sm:$0xf0]  ;;  %v1459_v11 = vld [vmem:[#allocation3 + $0x60] sm:$0xf] }
   0x7   :  { %v1595_v5 = vld [vmem:[#allocation3 + $0x170] sm:$0xf]  ;;  %v2072_v6 = vld [vmem:[#allocation3 + $0x174] sm:$0xf0]  ;;  %v1532_v7 = vor.u32 %v2056_v4, %v1531_v2  ;;  %v2038_v13 = vld [vmem:[#allocation3 + $0x64] sm:$0xf0] }
   0x8   :  { %v1596_v8 = vor.u32 %v2072_v6, %v1595_v5  ;;  %v1659_v9 = vld [vmem:[#allocation3 + $0x1f0] sm:$0xf]  ;;  %v2088_v10 = vld [vmem:[#allocation3 + $0x1f4] sm:$0xf0]  ;;  %870 = vmatpush.bf16.msra.mxu0 %v1468_v3  ;;  %v1523_v14 = vld [vmem:[#allocation3 + $0xe0] sm:$0xf]  ;;  %v1460_v16 = vor.u32 %v2038_v13, %v1459_v11 }
   0x9   :  { %v1660_v12 = vor.u32 %v2088_v10, %v1659_v9  ;;  %v2054_v15 = vld [vmem:[#allocation3 + $0xe4] sm:$0xf0]  ;;  %884 = vmatpush.bf16.msra.mxu1 %v1532_v7  ;;  %v1587_v18 = vld [vmem:[#allocation3 + $0x160] sm:$0xf]  ;;  %v1451_v23 = vld [vmem:[#allocation3 + $0x50] sm:$0xf] }
   0xa   :  { %898 = vmatpush.bf16.msra.mxu2 %v1596_v8  ;;  %v1524_v17 = vor.u32 %v2054_v15, %v1523_v14  ;;  %v2070_v19 = vld [vmem:[#allocation3 + $0x164] sm:$0xf0]  ;;  %v1651_v20 = vld [vmem:[#allocation3 + $0x1e0] sm:$0xf]  ;;  %v2036_v24 = vld [vmem:[#allocation3 + $0x54] sm:$0xf0] }
   0xb   :  { %912 = vmatpush.bf16.msra.mxu3 %v1660_v12  ;;  %v1588_v21 = vor.u32 %v2070_v19, %v1587_v18  ;;  %v2086_v22 = vld [vmem:[#allocation3 + $0x1e4] sm:$0xf0]  ;;  %v1515_v26 = vld [vmem:[#allocation3 + $0xd0] sm:$0xf]  ;;  %v2052_v27 = vld [vmem:[#allocation3 + $0xd4] sm:$0xf0]  ;;  %v1452_v29 = vor.u32 %v2036_v24, %v1451_v23 }
   0xc   :  { %v1652_v25 = vor.u32 %v2086_v22, %v1651_v20  ;;  %v1579_v28 = vld [vmem:[#allocation3 + $0x150] sm:$0xf]  ;;  %871 = vmatpush.bf16.msra.mxu0 %v1460_v16  ;;  %v2068_v30 = vld [vmem:[#allocation3 + $0x154] sm:$0xf0]  ;;  %v1516_v33 = vor.u32 %v2052_v27, %v1515_v26  ;;  %v1443_v35 = vld [vmem:[#allocation3 + $0x40] sm:$0xf] }
   0xd   :  { %v1643_v31 = vld [vmem:[#allocation3 + $0x1d0] sm:$0xf]  ;;  %v2084_v32 = vld [vmem:[#allocation3 + $0x1d4] sm:$0xf0]  ;;  %885 = vmatpush.bf16.msra.mxu1 %v1524_v17  ;;  %v1580_v34 = vor.u32 %v2068_v30, %v1579_v28  ;;  %v2034_v36 = vld [vmem:[#allocation3 + $0x44] sm:$0xf0] }
   0xe   :  { %899 = vmatpush.bf16.msra.mxu2 %v1588_v21  ;;  %v1507_v37 = vld [vmem:[#allocation3 + $0xc0] sm:$0xf]  ;;  %v1644_v38 = vor.u32 %v2084_v32, %v1643_v31  ;;  %v2050_v39 = vld [vmem:[#allocation3 + $0xc4] sm:$0xf0]  ;;  %v1444_v44 = vor.u32 %v2034_v36, %v1443_v35  ;;  %v1435_v47 = vld [vmem:[#allocation3 + $0x30] sm:$0xf] }
   0xf   :  { %913 = vmatpush.bf16.msra.mxu3 %v1652_v25  ;;  %v1571_v40 = vld [vmem:[#allocation3 + $0x140] sm:$0xf]  ;;  %v2066_v41 = vld [vmem:[#allocation3 + $0x144] sm:$0xf0]  ;;  %v1508_v45 = vor.u32 %v2050_v39, %v1507_v37  ;;  %v2032_v48 = vld [vmem:[#allocation3 + $0x34] sm:$0xf0] }
  0x10   :  { %v1635_v42 = vld [vmem:[#allocation3 + $0x1c0] sm:$0xf]  ;;  %v2082_v43 = vld [vmem:[#allocation3 + $0x1c4] sm:$0xf0]  ;;  %872 = vmatpush.bf16.msra.mxu0 %v1452_v29  ;;  %v1572_v46 = vor.u32 %v2066_v41, %v1571_v40  ;;  %v1499_v49 = vld [vmem:[#allocation3 + $0xb0] sm:$0xf]  ;;  %v1436_v56 = vor.u32 %v2032_v48, %v1435_v47 }
  0x11   :  { %886 = vmatpush.bf16.msra.mxu1 %v1516_v33  ;;  %v1636_v50 = vor.u32 %v2082_v43, %v1635_v42  ;;  %v2048_v51 = vld [vmem:[#allocation3 + $0xb4] sm:$0xf0]  ;;  %v1563_v52 = vld [vmem:[#allocation3 + $0x130] sm:$0xf]  ;;  %v1427_v59 = vld [vmem:[#allocation3 + $0x20] sm:$0xf] }
  0x12   :  { %900 = vmatpush.bf16.msra.mxu2 %v1580_v34  ;;  %v2064_v53 = vld [vmem:[#allocation3 + $0x134] sm:$0xf0]  ;;  %v1627_v54 = vld [vmem:[#allocation3 + $0x1b0] sm:$0xf]  ;;  %v1500_v57 = vor.u32 %v2048_v51, %v1499_v49  ;;  %v2030_v60 = vld [vmem:[#allocation3 + $0x24] sm:$0xf0] }
  0x13   :  { %914 = vmatpush.bf16.msra.mxu3 %v1644_v38  ;;  %v2080_v55 = vld [vmem:[#allocation3 + $0x1b4] sm:$0xf0]  ;;  %v1564_v58 = vor.u32 %v2064_v53, %v1563_v52  ;;  %v1491_v61 = vld [vmem:[#allocation3 + $0xa0] sm:$0xf]  ;;  %v2046_v63 = vld [vmem:[#allocation3 + $0xa4] sm:$0xf0]  ;;  %v1428_v4 = vor.u32 %v2030_v60, %v1427_v59 }
  0x14   :  { %873 = vmatpush.bf16.msra.mxu0 %v1444_v44  ;;  %v1628_v62 = vor.u32 %v2080_v55, %v1627_v54  ;;  %v1555_v0 = vld [vmem:[#allocation3 + $0x120] sm:$0xf]  ;;  %v2062_v1 = vld [vmem:[#allocation3 + $0x124] sm:$0xf0]  ;;  %v1492_v5 = vor.u32 %v2046_v63, %v1491_v61  ;;  %v1419_v7 = vld [vmem:[#allocation3 + $0x10] sm:$0xf] }
  0x15   :  { %887 = vmatpush.bf16.msra.mxu1 %v1508_v45  ;;  %v1619_v2 = vld [vmem:[#allocation3 + $0x1a0] sm:$0xf]  ;;  %v2078_v3 = vld [vmem:[#allocation3 + $0x1a4] sm:$0xf0]  ;;  %v1556_v6 = vor.u32 %v2062_v1, %v1555_v0  ;;  %v2028_v8 = vld [vmem:[#allocation3 + $0x14] sm:$0xf0] }
  0x16   :  { %901 = vmatpush.bf16.msra.mxu2 %v1572_v46  ;;  %v1483_v9 = vld [vmem:[#allocation3 + $0x90] sm:$0xf]  ;;  %v1620_v10 = vor.u32 %v2078_v3, %v1619_v2  ;;  %v2044_v11 = vld [vmem:[#allocation3 + $0x94] sm:$0xf0]  ;;  %v1420_v16 = vor.u32 %v2028_v8, %v1419_v7  ;;  %v1411_v17 = vld [vmem:[#allocation3] sm:$0xf] }
  0x17   :  { %915 = vmatpush.bf16.msra.mxu3 %v1636_v50  ;;  %v1547_v12 = vld [vmem:[#allocation3 + $0x110] sm:$0xf]  ;;  %v2060_v13 = vld [vmem:[#allocation3 + $0x114] sm:$0xf0]  ;;  %v2026_v18 = vld [vmem:[#allocation3 + $0x4] sm:$0xf0]  ;;  %v1484_v19 = vor.u32 %v2044_v11, %v1483_v9 }
  0x18   :  { %874 = vmatpush.bf16.msra.mxu0 %v1436_v56  ;;  %v1611_v14 = vld [vmem:[#allocation3 + $0x190] sm:$0xf]  ;;  %v2076_v15 = vld [vmem:[#allocation3 + $0x194] sm:$0xf0]  ;;  %v1548_v20 = vor.u32 %v2060_v13, %v1547_v12  ;;  %v1475_v21 = vld [vmem:[#allocation3 + $0x80] sm:$0xf]  ;;  %v1412_v31 = vor.u32 %v2026_v18, %v1411_v17 }
  0x19   :  { %888 = vmatpush.bf16.msra.mxu1 %v1500_v57  ;;  %v2042_v22 = vld [vmem:[#allocation3 + $0x84] sm:$0xf0]  ;;  %v1539_v23 = vld [vmem:[#allocation3 + $0x100] sm:$0xf]  ;;  %v1612_v24 = vor.u32 %v2076_v15, %v1611_v14  ;;  %v1723_v28 = vld [vmem:[#allocation3 + $0x270] sm:$0xf] }
  0x1a   :  { %902 = vmatpush.bf16.msra.mxu2 %v1564_v58  ;;  %v2058_v25 = vld [vmem:[#allocation3 + $0x104] sm:$0xf0]  ;;  %v1603_v26 = vld [vmem:[#allocation3 + $0x180] sm:$0xf]  ;;  %v2104_v29 = vld [vmem:[#allocation3 + $0x274] sm:$0xf0]  ;;  %v1476_v35 = vor.u32 %v2042_v22, %v1475_v21 }
  0x1b   :  { %916 = vmatpush.bf16.msra.mxu3 %v1628_v62  ;;  %v2074_v27 = vld [vmem:[#allocation3 + $0x184] sm:$0xf0]  ;;  %v1787_v30 = vld [vmem:[#allocation3 + $0x2f0] sm:$0xf]  ;;  %v2120_v32 = vld [vmem:[#allocation3 + $0x2f4] sm:$0xf0]  ;;  %v1540_v36 = vor.u32 %v2058_v25, %v1539_v23  ;;  %v1724_v40 = vor.u32 %v2104_v29, %v1723_v28 }
  0x1c   :  { %875 = vmatpush.bf16.msra.mxu0 %v1428_v4  ;;  %v1851_v33 = vld [vmem:[#allocation3 + $0x370] sm:$0xf]  ;;  %v2136_v34 = vld [vmem:[#allocation3 + $0x374] sm:$0xf0]  ;;  %v1604_v39 = vor.u32 %v2074_v27, %v1603_v26  ;;  %v1715_v41 = vld [vmem:[#allocation3 + $0x260] sm:$0xf]  ;;  %v1788_v43 = vor.u32 %v2120_v32, %v1787_v30 }
  0x1d   :  { %889 = vmatpush.bf16.msra.mxu1 %v1492_v5  ;;  %v1915_v37 = vld [vmem:[#allocation3 + $0x3f0] sm:$0xf]  ;;  %v2152_v38 = vld [vmem:[#allocation3 + $0x3f4] sm:$0xf0]  ;;  %v2102_v42 = vld [vmem:[#allocation3 + $0x264] sm:$0xf0]  ;;  %v1852_v44 = vor.u32 %v2136_v34, %v1851_v33 }
  0x1e   :  { %903 = vmatpush.bf16.msra.mxu2 %v1556_v6  ;;  %v1779_v45 = vld [vmem:[#allocation3 + $0x2e0] sm:$0xf]  ;;  %v2118_v46 = vld [vmem:[#allocation3 + $0x2e4] sm:$0xf0]  ;;  %v1916_v48 = vor.u32 %v2152_v38, %v1915_v37  ;;  %v1716_v55 = vor.u32 %v2102_v42, %v1715_v41  ;;  %v1707_v56 = vld [vmem:[#allocation3 + $0x250] sm:$0xf] }
  0x1f   :  { %917 = vmatpush.bf16.msra.mxu3 %v1620_v10  ;;  %v1843_v47 = vld [vmem:[#allocation3 + $0x360] sm:$0xf]  ;;  %v2134_v49 = vld [vmem:[#allocation3 + $0x364] sm:$0xf0]  ;;  %v2100_v57 = vld [vmem:[#allocation3 + $0x254] sm:$0xf0]  ;;  %v1780_v60 = vor.u32 %v2118_v46, %v1779_v45 }
  0x20   :  { %876 = vmatpush.bf16.msra.mxu0 %v1420_v16  ;;  %v1907_v50 = vld [vmem:[#allocation3 + $0x3e0] sm:$0xf]  ;;  %v2150_v51 = vld [vmem:[#allocation3 + $0x3e4] sm:$0xf0]  ;;  %v1844_v61 = vor.u32 %v2134_v49, %v1843_v47  ;;  %v1771_v62 = vld [vmem:[#allocation3 + $0x2d0] sm:$0xf]  ;;  %v1708_v9 = vor.u32 %v2100_v57, %v1707_v56 }
  0x21   :  { %890 = vmatpush.bf16.msra.mxu1 %v1484_v19  ;;  %v1379_v52 = vld [vmem:[%s2425_s0] sm:$0xf]  ;;  %v1387_v54 = vld [vmem:[%s2425_s0 + $0x8] sm:$0xf]  ;;  %v2116_v63 = vld [vmem:[#allocation3 + $0x2d4] sm:$0xf0]  ;;  %v1908_v2 = vor.u32 %v2150_v51, %v1907_v50 }
  0x22   :  { %904 = vmatpush.bf16.msra.mxu2 %v1548_v20  ;;  %v2021_v53 = vld [vmem:[%s2425_s0 + $0x1c] sm:$0xf0]  ;;  %v2022_v59 = vld [vmem:[%s2425_s0 + $0x24] sm:$0xf0]  ;;  %v1835_v0 = vld [vmem:[#allocation3 + $0x350] sm:$0xf]  ;;  %v1772_v12 = vor.u32 %v2116_v63, %v1771_v62 }
  0x23   :  { %918 = vmatpush.bf16.msra.mxu3 %v1612_v24  ;;  %v2263_v58 = vor.u32 %v2021_v53, %v1379_v52  ;;  %v2268_v1 = vor.u32 %v2022_v59, %v1387_v54  ;;  %v2132_v3 = vld [vmem:[#allocation3 + $0x354] sm:$0xf0]  ;;  %v1899_v4 = vld [vmem:[#allocation3 + $0x3d0] sm:$0xf]  ;;  %v2017_v6 = vld [vmem:[%s2425_s0 + $0x4] sm:$0xf] }
  0x24   :  { %877 = vmatpush.bf16.msra.mxu0 %v1412_v31  ;;  %v2148_v5 = vld [vmem:[#allocation3 + $0x3d4] sm:$0xf0]  ;;  %v1381_v7 = vld [vmem:[%s2425_s0 + $0x20] sm:$0xf0]  ;;  %v2018_v8 = vld [vmem:[%s2425_s0 + $0xc] sm:$0xf]  ;;  %v1836_v13 = vor.u32 %v2132_v3, %v1835_v0 }
  0x25   :  { %891 = vmatpush.bf16.msra.mxu1 %v1476_v35  ;;  %v2281_v10 = vor.u32 %v2017_v6, %v1381_v7  ;;  %v1389_v11 = vld [vmem:[%s2425_s0 + $0x28] sm:$0xf0]  ;;  %v1699_v14 = vld [vmem:[#allocation3 + $0x240] sm:$0xf]  ;;  %v2098_v15 = vld [vmem:[#allocation3 + $0x244] sm:$0xf0]  ;;  %v1900_v18 = vor.u32 %v2148_v5, %v1899_v4 }
  0x26   :  { %905 = vmatpush.bf16.msra.mxu2 %v1540_v36  ;;  %v1763_v16 = vld [vmem:[#allocation3 + $0x2c0] sm:$0xf]  ;;  %v2286_v17 = vor.u32 %v2018_v8, %v1389_v11  ;;  %v2114_v19 = vld [vmem:[#allocation3 + $0x2c4] sm:$0xf0]  ;;  %v1700_v24 = vor.u32 %v2098_v15, %v1699_v14  ;;  %v1691_v27 = vld [vmem:[#allocation3 + $0x230] sm:$0xf] }
  0x27   :  { %919 = vmatpush.bf16.msra.mxu3 %v1604_v39  ;;  %878 = vmatmul.bf16.vlgmr.msra.gmra.mxu0 %v2263_v58  ;;  %v1827_v20 = vld [vmem:[#allocation3 + $0x340] sm:$0xf]  ;;  %v2130_v21 = vld [vmem:[#allocation3 + $0x344] sm:$0xf0]  ;;  %v1764_v25 = vor.u32 %v2114_v19, %v1763_v16  ;;  %v2096_v28 = vld [vmem:[#allocation3 + $0x234] sm:$0xf0] }
  0x28   :  { %926 = vmatpush.bf16.msrb.mxu0 %v1724_v40  ;;  %892 = vmatmul.bf16.vlgmr.msra.gmra.mxu1 %v2281_v10  ;;  %v1891_v22 = vld [vmem:[#allocation3 + $0x3c0] sm:$0xf]  ;;  %v2146_v23 = vld [vmem:[#allocation3 + $0x3c4] sm:$0xf0]  ;;  %v1828_v26 = vor.u32 %v2130_v21, %v1827_v20  ;;  %v1755_v29 = vld [vmem:[#allocation3 + $0x2b0] sm:$0xf]  ;;  %v1692_v36 = vor.u32 %v2096_v28, %v1691_v27 }
  0x29   :  { %940 = vmatpush.bf16.msrb.mxu1 %v1788_v43  ;;  %906 = vmatmul.bf16.vlgmr.msra.gmra.mxu2 %v2268_v1  ;;  %v1892_v30 = vor.u32 %v2146_v23, %v1891_v22  ;;  %v2112_v31 = vld [vmem:[#allocation3 + $0x2b4] sm:$0xf0]  ;;  %v1819_v32 = vld [vmem:[#allocation3 + $0x330] sm:$0xf]  ;;  %v1683_v39 = vld [vmem:[#allocation3 + $0x220] sm:$0xf] }
  0x2a   :  { %954 = vmatpush.bf16.msrb.mxu2 %v1852_v44  ;;  %920 = vmatmul.bf16.vlgmr.msra.gmra.mxu3 %v2286_v17  ;;  %v2128_v33 = vld [vmem:[#allocation3 + $0x334] sm:$0xf0]  ;;  %v1883_v34 = vld [vmem:[#allocation3 + $0x3b0] sm:$0xf]  ;;  %v1756_v37 = vor.u32 %v2112_v31, %v1755_v29  ;;  %v2094_v40 = vld [vmem:[#allocation3 + $0x224] sm:$0xf0] }
  0x2b   :  { %968 = vmatpush.bf16.msrb.mxu3 %v1916_v48  ;;  %v2144_v35 = vld [vmem:[#allocation3 + $0x3b4] sm:$0xf0]  ;;  %v1820_v38 = vor.u32 %v2128_v33, %v1819_v32  ;;  %v1747_v41 = vld [vmem:[#allocation3 + $0x2a0] sm:$0xf]  ;;  %v2110_v43 = vld [vmem:[#allocation3 + $0x2a4] sm:$0xf0]  ;;  %v1684_v48 = vor.u32 %v2094_v40, %v1683_v39 }
  0x2c   :  { %927 = vmatpush.bf16.msrb.mxu0 %v1716_v55  ;;  %v1884_v42 = vor.u32 %v2144_v35, %v1883_v34  ;;  %v1811_v44 = vld [vmem:[#allocation3 + $0x320] sm:$0xf]  ;;  %v2126_v45 = vld [vmem:[#allocation3 + $0x324] sm:$0xf0]  ;;  %v1675_v49 = vld [vmem:[#allocation3 + $0x210] sm:$0xf]  ;;  %v1748_v50 = vor.u32 %v2110_v43, %v1747_v41 }
  0x2d   :  { %941 = vmatpush.bf16.msrb.mxu1 %v1780_v60  ;;  %v1875_v46 = vld [vmem:[#allocation3 + $0x3a0] sm:$0xf]  ;;  %v2142_v47 = vld [vmem:[#allocation3 + $0x3a4] sm:$0xf0]  ;;  %v1812_v51 = vor.u32 %v2126_v45, %v1811_v44  ;;  %v2092_v52 = vld [vmem:[#allocation3 + $0x214] sm:$0xf0] }
  0x2e   :  { %955 = vmatpush.bf16.msrb.mxu2 %v1844_v61  ;;  %v1739_v53 = vld [vmem:[#allocation3 + $0x290] sm:$0xf]  ;;  %v2108_v54 = vld [vmem:[#allocation3 + $0x294] sm:$0xf0]  ;;  %v1876_v55 = vor.u32 %v2142_v47, %v1875_v46  ;;  %v1667_v61 = vld [vmem:[#allocation3 + $0x200] sm:$0xf]  ;;  %v1676_v63 = vor.u32 %v2092_v52, %v1675_v49 }
  0x2f   :  { %969 = vmatpush.bf16.msrb.mxu3 %v1908_v2  ;;  %v1803_v56 = vld [vmem:[#allocation3 + $0x310] sm:$0xf]  ;;  %v2124_v57 = vld [vmem:[#allocation3 + $0x314] sm:$0xf0]  ;;  %v2090_v62 = vld [vmem:[#allocation3 + $0x204] sm:$0xf0]  ;;  %v1740_v5 = vor.u32 %v2108_v54, %v1739_v53 }
  0x30   :  { %928 = vmatpush.bf16.msrb.mxu0 %v1708_v9  ;;  %v1867_v59 = vld [vmem:[#allocation3 + $0x390] sm:$0xf]  ;;  %v2140_v60 = vld [vmem:[#allocation3 + $0x394] sm:$0xf0]  ;;  %v1731_v0 = vld [vmem:[#allocation3 + $0x280] sm:$0xf]  ;;  %v1804_v6 = vor.u32 %v2124_v57, %v1803_v56  ;;  %v1668_v19 = vor.u32 %v2090_v62, %v1667_v61 }
  0x31   :  { %942 = vmatpush.bf16.msrb.mxu1 %v1772_v12  ;;  %v2106_v2 = vld [vmem:[#allocation3 + $0x284] sm:$0xf0]  ;;  %v1795_v3 = vld [vmem:[#allocation3 + $0x300] sm:$0xf]  ;;  %v2039_v9 = vld [vmem:[#allocation3 + $0x74] sm:$0xf]  ;;  %v1868_v11 = vor.u32 %v2140_v60, %v1867_v59 }
  0x32   :  { %956 = vmatpush.bf16.msrb.mxu2 %v1836_v13  ;;  %v2122_v4 = vld [vmem:[#allocation3 + $0x304] sm:$0xf0]  ;;  %v1859_v7 = vld [vmem:[#allocation3 + $0x380] sm:$0xf]  ;;  %v1469_v12 = vld [vmem:[#allocation3 + $0x78] sm:$0xf0]  ;;  %v1732_v23 = vor.u32 %v2106_v2, %v1731_v0 }
  0x33   :  { %970 = vmatpush.bf16.msrb.mxu3 %v1900_v18  ;;  %v2138_v8 = vld [vmem:[#allocation3 + $0x384] sm:$0xf0]  ;;  %v2055_v13 = vld [vmem:[#allocation3 + $0xf4] sm:$0xf]  ;;  %v1533_v14 = vld [vmem:[#allocation3 + $0xf8] sm:$0xf0]  ;;  %v1472_v29 = vor.u32 %v2039_v9, %v1469_v12 }
  0x34   :  { %929 = vmatpush.bf16.msrb.mxu0 %v1700_v24  ;;  %v2071_v15 = vld [vmem:[#allocation3 + $0x174] sm:$0xf]  ;;  %v1597_v16 = vld [vmem:[#allocation3 + $0x178] sm:$0xf0]  ;;  %v1395_v21 = vld [vmem:[%s2425_s0 + $0x10] sm:$0xf]  ;;  %v1796_v24 = vor.u32 %v2122_v4, %v1795_v3  ;;  %v1860_v28 = vor.u32 %v2138_v8, %v1859_v7  ;;  %v1536_v33 = vor.u32 %v2055_v13, %v1533_v14 }
  0x35   :  { %943 = vmatpush.bf16.msrb.mxu1 %v1764_v25  ;;  %v2087_v18 = vld [vmem:[#allocation3 + $0x1f4] sm:$0xf]  ;;  %v1661_v20 = vld [vmem:[#allocation3 + $0x1f8] sm:$0xf0]  ;;  %v2023_v22 = vld [vmem:[%s2425_s0 + $0x2c] sm:$0xf0]  ;;  %v1600_v34 = vor.u32 %v2071_v15, %v1597_v16 }
  0x36   :  { %957 = vmatpush.bf16.msrb.mxu2 %v1828_v26  ;;  %v1403_v25 = vld [vmem:[%s2425_s0 + $0x18] sm:$0xf]  ;;  %v2019_v27 = vld [vmem:[%s2425_s0 + $0x14] sm:$0xf]  ;;  %v2020_v31 = vld [vmem:[%s2425_s0 + $0x1c] sm:$0xf]  ;;  %v2314_v39 = vor.u32 %v2023_v22, %v1395_v21 }
  0x37   :  { %971 = vmatpush.bf16.msrb.mxu3 %v1892_v30  ;;  %v2024_v26 = vld [vmem:[%s2425_s0 + $0x34] sm:$0xf0]  ;;  %v1397_v30 = vld [vmem:[%s2425_s0 + $0x30] sm:$0xf0]  ;;  %v1405_v32 = vld [vmem:[%s2425_s0 + $0x38] sm:$0xf0] }
  0x38   :  { %930 = vmatpush.bf16.msrb.mxu0 %v1692_v36  ;;  %v2037_v35 = vld [vmem:[#allocation3 + $0x64] sm:$0xf]  ;;  %v1461_v36 = vld [vmem:[#allocation3 + $0x68] sm:$0xf0]  ;;  %v2316_v43 = vor.u32 %v2024_v26, %v1403_v25  ;;  %v2318_v44 = vor.u32 %v2019_v27, %v1397_v30  ;;  %v2320_v47 = vor.u32 %v2020_v31, %v1405_v32  ;;  %v1453_v52 = vld [vmem:[#allocation3 + $0x58] sm:$0xf0] }
  0x39   :  { %944 = vmatpush.bf16.msrb.mxu1 %v1756_v37  ;;  %v2053_v37 = vld [vmem:[#allocation3 + $0xe4] sm:$0xf]  ;;  %v1525_v40 = vld [vmem:[#allocation3 + $0xe8] sm:$0xf0]  ;;  %v2051_v53 = vld [vmem:[#allocation3 + $0xd4] sm:$0xf] }
  0x3a   :  { %958 = vmatpush.bf16.msrb.mxu2 %v1820_v38  ;;  %v1664_v38 = vor.u32 %v2087_v18, %v1661_v20  ;;  %v2069_v41 = vld [vmem:[#allocation3 + $0x164] sm:$0xf]  ;;  %v1653_v46 = vld [vmem:[#allocation3 + $0x1e8] sm:$0xf0]  ;;  %v1528_v49 = vor.u32 %v2053_v37, %v1525_v40  ;;  %v2067_v56 = vld [vmem:[#allocation3 + $0x154] sm:$0xf] }
  0x3b   :  { %972 = vmatpush.bf16.msrb.mxu3 %v1884_v42  ;;  %v1589_v42 = vld [vmem:[#allocation3 + $0x168] sm:$0xf0]  ;;  %v2085_v45 = vld [vmem:[#allocation3 + $0x1e4] sm:$0xf]  ;;  %v1581_v57 = vld [vmem:[#allocation3 + $0x158] sm:$0xf0] }
  0x3c   :  { %931 = vmatpush.bf16.msrb.mxu0 %v1684_v48  ;;  %v1464_v48 = vor.u32 %v2037_v35, %v1461_v36  ;;  %v1656_v54 = vor.u32 %v2085_v45, %v1653_v46  ;;  %v2083_v59 = vld [vmem:[#allocation3 + $0x1d4] sm:$0xf]  ;;  %v1645_v60 = vld [vmem:[#allocation3 + $0x1d8] sm:$0xf0]  ;;  %v2033_v0 = vld [vmem:[#allocation3 + $0x44] sm:$0xf] }
  0x3d   :  { %945 = vmatpush.bf16.msrb.mxu1 %v1748_v50  ;;  %v1592_v50 = vor.u32 %v2069_v41, %v1589_v42  ;;  %v1445_v2 = vld [vmem:[#allocation3 + $0x48] sm:$0xf0]  ;;  %v2049_v3 = vld [vmem:[#allocation3 + $0xc4] sm:$0xf]  ;;  %v1648_v4 = vor.u32 %v2083_v59, %v1645_v60  ;;  %v2031_v14 = vld [vmem:[#allocation3 + $0x34] sm:$0xf] }
  0x3e   :  { %959 = vmatpush.bf16.msrb.mxu2 %v1812_v51  ;;  %v2035_v51 = vld [vmem:[#allocation3 + $0x54] sm:$0xf]  ;;  %v1573_v7 = vld [vmem:[#allocation3 + $0x148] sm:$0xf0]  ;;  %v2081_v8 = vld [vmem:[#allocation3 + $0x1c4] sm:$0xf] }
  0x3f   :  { %973 = vmatpush.bf16.msrb.mxu3 %v1876_v55  ;;  %v1517_v55 = vld [vmem:[#allocation3 + $0xd8] sm:$0xf0]  ;;  %v1456_v61 = vor.u32 %v2035_v51, %v1453_v52  ;;  %v1637_v9 = vld [vmem:[#allocation3 + $0x1c8] sm:$0xf0]  ;;  %v2047_v16 = vld [vmem:[#allocation3 + $0xb4] sm:$0xf] }
  0x40   :  { %932 = vmatpush.bf16.msrb.mxu0 %v1676_v63  ;;  %v1520_v62 = vor.u32 %v2051_v53, %v1517_v55  ;;  %v1584_v63 = vor.u32 %v2067_v56, %v1581_v57  ;;  %v1437_v15 = vld [vmem:[#allocation3 + $0x38] sm:$0xf0]  ;;  %v1640_v18 = vor.u32 %v2081_v8, %v1637_v9  ;;  %v2063_v20 = vld [vmem:[#allocation3 + $0x134] sm:$0xf]  ;;  %v2029_v27 = vld [vmem:[#allocation3 + $0x24] sm:$0xf] }
  0x41   :  { %946 = vmatpush.bf16.msrb.mxu1 %v1740_v5  ;;  %v1509_v5 = vld [vmem:[#allocation3 + $0xc8] sm:$0xf0]  ;;  %v1565_v21 = vld [vmem:[#allocation3 + $0x138] sm:$0xf0]  ;;  %v2079_v22 = vld [vmem:[#allocation3 + $0x1b4] sm:$0xf] }
  0x42   :  { %960 = vmatpush.bf16.msrb.mxu2 %v1804_v6  ;;  %v2065_v6 = vld [vmem:[#allocation3 + $0x144] sm:$0xf]  ;;  %v1512_v12 = vor.u32 %v2049_v3, %v1509_v5  ;;  %v1568_v26 = vor.u32 %v2063_v20, %v1565_v21  ;;  %v1493_v31 = vld [vmem:[#allocation3 + $0xa8] sm:$0xf0]  ;;  %v2027_v40 = vld [vmem:[#allocation3 + $0x14] sm:$0xf] }
  0x43   :  { %974 = vmatpush.bf16.msrb.mxu3 %v1868_v11  ;;  %v1448_v11 = vor.u32 %v2033_v0, %v1445_v2  ;;  %v1576_v13 = vor.u32 %v2065_v6, %v1573_v7  ;;  %v2061_v32 = vld [vmem:[#allocation3 + $0x124] sm:$0xf]  ;;  %v1621_v35 = vld [vmem:[#allocation3 + $0x1a8] sm:$0xf0]  ;;  %v1421_v41 = vld [vmem:[#allocation3 + $0x18] sm:$0xf0] }
  0x44   :  { %933 = vmatpush.bf16.msrb.mxu0 %v1668_v19  ;;  %v1501_v19 = vld [vmem:[#allocation3 + $0xb8] sm:$0xf0]  ;;  %v2043_v42 = vld [vmem:[#allocation3 + $0x94] sm:$0xf]  ;;  %v1424_v52 = vor.u32 %v2027_v40, %v1421_v41  ;;  %v2025_v53 = vld [vmem:[#allocation3 + $0x4] sm:$0xf] }
  0x45   :  { %947 = vmatpush.bf16.msrb.mxu1 %v1732_v23  ;;  %v1629_v23 = vld [vmem:[#allocation3 + $0x1b8] sm:$0xf0]  ;;  %v1504_v25 = vor.u32 %v2047_v16, %v1501_v19  ;;  %v2041_v57 = vld [vmem:[#allocation3 + $0x84] sm:$0xf]  ;;  %v1477_v59 = vld [vmem:[#allocation3 + $0x88] sm:$0xf0] }
  0x46   :  { %961 = vmatpush.bf16.msrb.mxu2 %v1796_v24  ;;  %v1440_v24 = vor.u32 %v2031_v14, %v1437_v15  ;;  %v1632_v30 = vor.u32 %v2079_v22, %v1629_v23  ;;  %v1485_v46 = vld [vmem:[#allocation3 + $0x98] sm:$0xf0]  ;;  %v2057_v60 = vld [vmem:[#allocation3 + $0x104] sm:$0xf]  ;;  %v1605_v0 = vld [vmem:[#allocation3 + $0x188] sm:$0xf0]  ;;  %v1480_v9 = vor.u32 %v2041_v57, %v1477_v59 }
  0x47   :  { %975 = vmatpush.bf16.msrb.mxu3 %v1860_v28  ;;  %934 = vmatmul.bf16.vlgmr.msrb.gmra.mxu0 %v2314_v39  ;;  %v1429_v28 = vld [vmem:[#allocation3 + $0x28] sm:$0xf0]  ;;  %v1613_v51 = vld [vmem:[#allocation3 + $0x198] sm:$0xf0]  ;;  %v1488_v55 = vor.u32 %v2043_v42, %v1485_v46  ;;  %v2103_v2 = vld [vmem:[#allocation3 + $0x274] sm:$0xf] }
  0x48   :  { %982 = vmatpush.bf16.msra.mxu0 %v1472_v29  ;;  %948 = vmatmul.bf16.vlgmr.msrb.gmra.mxu1 %v2318_v44  ;;  %v2045_v29 = vld [vmem:[#allocation3 + $0xa4] sm:$0xf]  ;;  %v1432_v36 = vor.u32 %v2029_v27, %v1429_v28  ;;  %v1725_v3 = vld [vmem:[#allocation3 + $0x278] sm:$0xf0]  ;;  %v2135_v7 = vld [vmem:[#allocation3 + $0x374] sm:$0xf] }
  0x49   :  { %996 = vmatpush.bf16.msra.mxu1 %v1536_v33  ;;  %962 = vmatmul.bf16.vlgmr.msrb.gmra.mxu2 %v2316_v43  ;;  %v1557_v33 = vld [vmem:[#allocation3 + $0x128] sm:$0xf0]  ;;  %v1496_v37 = vor.u32 %v2045_v29, %v1493_v31  ;;  %v1789_v6 = vld [vmem:[#allocation3 + $0x2f8] sm:$0xf0]  ;;  %v1728_v15 = vor.u32 %v2103_v2, %v1725_v3  ;;  %v2101_v16 = vld [vmem:[#allocation3 + $0x264] sm:$0xf] }
  0x4a   :  { %1010 = vmatpush.bf16.msra.mxu2 %v1600_v34  ;;  %976 = vmatmul.bf16.vlgmr.msrb.gmra.mxu3 %v2320_v47  ;;  %v2077_v34 = vld [vmem:[#allocation3 + $0x1a4] sm:$0xf]  ;;  %v1853_v8 = vld [vmem:[#allocation3 + $0x378] sm:$0xf0]  ;;  %v1781_v22 = vld [vmem:[#allocation3 + $0x2e8] sm:$0xf0] }
  0x4b   :  { %1024 = vmatpush.bf16.msra.mxu3 %v1664_v38  ;;  %v1560_v38 = vor.u32 %v2061_v32, %v1557_v33  ;;  %v1624_v45 = vor.u32 %v2077_v34, %v1621_v35  ;;  %v1856_v20 = vor.u32 %v2135_v7, %v1853_v8  ;;  %v2117_v21 = vld [vmem:[#allocation3 + $0x2e4] sm:$0xf]  ;;  %v1909_v27 = vld [vmem:[#allocation3 + $0x3e8] sm:$0xf0]  ;;  %v2099_v31 = vld [vmem:[#allocation3 + $0x254] sm:$0xf] }
  0x4c   :  { %983 = vmatpush.bf16.msra.mxu0 %v1464_v48  ;;  %v2059_v48 = vld [vmem:[#allocation3 + $0x114] sm:$0xf]  ;;  %v1784_v29 = vor.u32 %v2117_v21, %v1781_v22  ;;  %v1709_v32 = vld [vmem:[#allocation3 + $0x258] sm:$0xf0]  ;;  %v2097_v46 = vld [vmem:[#allocation3 + $0x244] sm:$0xf] }
  0x4d   :  { %997 = vmatpush.bf16.msra.mxu1 %v1528_v49  ;;  %v1549_v49 = vld [vmem:[#allocation3 + $0x118] sm:$0xf0]  ;;  %v2115_v33 = vld [vmem:[#allocation3 + $0x2d4] sm:$0xf]  ;;  %v1712_v41 = vor.u32 %v2099_v31, %v1709_v32  ;;  %v2109_v7 = vld [vmem:[#allocation3 + $0x2a4] sm:$0xf] }
  0x4e   :  { %1011 = vmatpush.bf16.msra.mxu2 %v1592_v50  ;;  %v2075_v50 = vld [vmem:[#allocation3 + $0x194] sm:$0xf]  ;;  %v1552_v56 = vor.u32 %v2059_v48, %v1549_v49  ;;  %v1773_v35 = vld [vmem:[#allocation3 + $0x2d8] sm:$0xf0]  ;;  %v1701_v48 = vld [vmem:[#allocation3 + $0x248] sm:$0xf0] }
  0x4f   :  { %1025 = vmatpush.bf16.msra.mxu3 %v1656_v54  ;;  %v1413_v54 = vld [vmem:[#allocation3 + $0x8] sm:$0xf0]  ;;  %v1901_v40 = vld [vmem:[#allocation3 + $0x3d8] sm:$0xf0]  ;;  %v1776_v42 = vor.u32 %v2115_v33, %v1773_v35  ;;  %v2111_v57 = vld [vmem:[#allocation3 + $0x2b4] sm:$0xf] }
  0x50   :  { %984 = vmatpush.bf16.msra.mxu0 %v1456_v61  ;;  %v1616_v61 = vor.u32 %v2075_v50, %v1613_v51  ;;  %v1416_v5 = vor.u32 %v2025_v53, %v1413_v54  ;;  %v1765_v50 = vld [vmem:[#allocation3 + $0x2c8] sm:$0xf0]  ;;  %v2129_v51 = vld [vmem:[#allocation3 + $0x344] sm:$0xf]  ;;  %v2107_v21 = vld [vmem:[#allocation3 + $0x294] sm:$0xf] }
  0x51   :  { %998 = vmatpush.bf16.msra.mxu1 %v1520_v62  ;;  %v1541_v62 = vld [vmem:[#allocation3 + $0x108] sm:$0xf0]  ;;  %v2089_v31 = vld [vmem:[#allocation3 + $0x204] sm:$0xf] }
  0x52   :  { %1012 = vmatpush.bf16.msra.mxu2 %v1584_v63  ;;  %v2073_v63 = vld [vmem:[#allocation3 + $0x184] sm:$0xf]  ;;  %v1893_v53 = vld [vmem:[#allocation3 + $0x3c8] sm:$0xf0] }
  0x53   :  { %1026 = vmatpush.bf16.msra.mxu3 %v1648_v4  ;;  %v2119_v4 = vld [vmem:[#allocation3 + $0x2f4] sm:$0xf]  ;;  %v1608_v14 = vor.u32 %v2073_v63, %v1605_v0  ;;  %v1885_v0 = vld [vmem:[#allocation3 + $0x3b8] sm:$0xf0]  ;;  %v1669_v32 = vld [vmem:[#allocation3 + $0x208] sm:$0xf0] }
  0x54   :  { %985 = vmatpush.bf16.msra.mxu0 %v1448_v11  ;;  %v1544_v11 = vor.u32 %v2057_v60, %v1541_v62  ;;  %v1792_v19 = vor.u32 %v2119_v4, %v1789_v6  ;;  %v1757_v60 = vld [vmem:[#allocation3 + $0x2b8] sm:$0xf0]  ;;  %v2143_v63 = vld [vmem:[#allocation3 + $0x3b4] sm:$0xf]  ;;  %v1685_v6 = vld [vmem:[#allocation3 + $0x228] sm:$0xf0] }
  0x55   :  { %999 = vmatpush.bf16.msra.mxu1 %v1512_v12  ;;  %v2151_v12 = vld [vmem:[#allocation3 + $0x3f4] sm:$0xf]  ;;  %v1821_v62 = vld [vmem:[#allocation3 + $0x338] sm:$0xf0]  ;;  %v1760_v3 = vor.u32 %v2111_v57, %v1757_v60  ;;  %v1888_v8 = vor.u32 %v2143_v63, %v1885_v0  ;;  %v2105_v33 = vld [vmem:[#allocation3 + $0x284] sm:$0xf] }
  0x56   :  { %1013 = vmatpush.bf16.msra.mxu2 %v1576_v13  ;;  %v1917_v13 = vld [vmem:[#allocation3 + $0x3f8] sm:$0xf0]  ;;  %v1733_v35 = vld [vmem:[#allocation3 + $0x288] sm:$0xf0] }
  0x57   :  { %1027 = vmatpush.bf16.msra.mxu3 %v1640_v18  ;;  %v1717_v18 = vld [vmem:[#allocation3 + $0x268] sm:$0xf0]  ;;  %v1920_v23 = vor.u32 %v2151_v12, %v1917_v13  ;;  %v2141_v13 = vld [vmem:[#allocation3 + $0x3a4] sm:$0xf] }
  0x58   :  { %986 = vmatpush.bf16.msra.mxu0 %v1440_v24  ;;  %v2133_v24 = vld [vmem:[#allocation3 + $0x364] sm:$0xf]  ;;  %v1720_v28 = vor.u32 %v2101_v16, %v1717_v18  ;;  %v1813_v12 = vld [vmem:[#allocation3 + $0x328] sm:$0xf0] }
  0x59   :  { %1000 = vmatpush.bf16.msra.mxu1 %v1504_v25  ;;  %v1845_v25 = vld [vmem:[#allocation3 + $0x368] sm:$0xf0] }
  0x5a   :  { %1014 = vmatpush.bf16.msra.mxu2 %v1568_v26  ;;  %v2149_v26 = vld [vmem:[#allocation3 + $0x3e4] sm:$0xf] }
  0x5b   :  { %1028 = vmatpush.bf16.msra.mxu3 %v1632_v30  ;;  %v1848_v30 = vor.u32 %v2133_v24, %v1845_v25  ;;  %v1912_v34 = vor.u32 %v2149_v26, %v1909_v27  ;;  %v2123_v24 = vld [vmem:[#allocation3 + $0x314] sm:$0xf]  ;;  %v1805_v25 = vld [vmem:[#allocation3 + $0x318] sm:$0xf0] }
  0x5c   :  { %987 = vmatpush.bf16.msra.mxu0 %v1432_v36  ;;  %v2131_v36 = vld [vmem:[#allocation3 + $0x354] sm:$0xf]  ;;  %v1869_v27 = vld [vmem:[#allocation3 + $0x398] sm:$0xf0] }
  0x5d   :  { %1001 = vmatpush.bf16.msra.mxu1 %v1496_v37  ;;  %v1837_v37 = vld [vmem:[#allocation3 + $0x358] sm:$0xf0]  ;;  %v2139_v26 = vld [vmem:[#allocation3 + $0x394] sm:$0xf] }
  0x5e   :  { %1015 = vmatpush.bf16.msra.mxu2 %v1560_v38  ;;  %v2147_v38 = vld [vmem:[#allocation3 + $0x3d4] sm:$0xf] }
  0x5f   :  { %1029 = vmatpush.bf16.msra.mxu3 %v1624_v45  ;;  %v1840_v45 = vor.u32 %v2131_v36, %v1837_v37  ;;  %v1904_v49 = vor.u32 %v2147_v38, %v1901_v40  ;;  %v2121_v36 = vld [vmem:[#allocation3 + $0x304] sm:$0xf]  ;;  %v1797_v37 = vld [vmem:[#allocation3 + $0x308] sm:$0xf0] }
  0x60   :  { %988 = vmatpush.bf16.msra.mxu0 %v1424_v52  ;;  %v2145_v52 = vld [vmem:[#allocation3 + $0x3c4] sm:$0xf]  ;;  %v1861_v40 = vld [vmem:[#allocation3 + $0x388] sm:$0xf0] }
  0x61   :  { %1002 = vmatpush.bf16.msra.mxu1 %v1488_v55  ;;  %v2095_v55 = vld [vmem:[#allocation3 + $0x234] sm:$0xf]  ;;  %v1896_v59 = vor.u32 %v2145_v52, %v1893_v53  ;;  %v2137_v38 = vld [vmem:[#allocation3 + $0x384] sm:$0xf] }
  0x62   :  { %1016 = vmatpush.bf16.msra.mxu2 %v1552_v56  ;;  %v1693_v56 = vld [vmem:[#allocation3 + $0x238] sm:$0xf0] }
  0x63   :  { %1030 = vmatpush.bf16.msra.mxu3 %v1616_v61  ;;  %v2127_v61 = vld [vmem:[#allocation3 + $0x334] sm:$0xf]  ;;  %v1696_v2 = vor.u32 %v2095_v55, %v1693_v56 }
  0x64   :  { %989 = vmatpush.bf16.msra.mxu0 %v1416_v5  ;;  %v1824_v4 = vor.u32 %v2127_v61, %v1821_v62  ;;  %v2093_v5 = vld [vmem:[#allocation3 + $0x224] sm:$0xf] }
  0x65   :  { %1003 = vmatpush.bf16.msra.mxu1 %v1480_v9  ;;  %v1749_v9 = vld [vmem:[#allocation3 + $0x2a8] sm:$0xf0] }
  0x66   :  { %1017 = vmatpush.bf16.msra.mxu2 %v1544_v11  ;;  %v2125_v11 = vld [vmem:[#allocation3 + $0x324] sm:$0xf]  ;;  %v1752_v16 = vor.u32 %v2109_v7, %v1749_v9  ;;  %v2361_v9 = vld [vmem:[%s2427_s2] sm:$0x3] }
  0x67   :  { %1031 = vmatpush.bf16.msra.mxu3 %v1608_v14  ;;  %990 = vmatmul.bf16.vlgmr.msra.gmra.mxu0 %v2263_v58  ;;  %v1704_v58 = vor.u32 %v2097_v46, %v1701_v48  ;;  %v1877_v14 = vld [vmem:[#allocation3 + $0x3a8] sm:$0xf0]  ;;  %v1816_v18 = vor.u32 %v2125_v11, %v1813_v12  ;;  %v1864_v46 = vor.u32 %v2137_v38, %v1861_v40  ;;  %v2160_v48 = vld [vmem:[%s2428_s3 + $0x38] sm:$0xff] }
  0x68   :  { %1038 = vmatpush.bf16.msrb.mxu0 %v1728_v15  ;;  %1004 = vmatmul.bf16.vlgmr.msra.gmra.mxu1 %v2281_v10  ;;  %v1688_v15 = vor.u32 %v2093_v5, %v1685_v6  ;;  %v1880_v22 = vor.u32 %v2141_v13, %v1877_v14  ;;  %v1111_v13 = vperm.slane %v2361_v9, 0 }
  0x69   :  { %1052 = vmatpush.bf16.msrb.mxu1 %v1792_v19  ;;  %1018 = vmatmul.bf16.vlgmr.msra.gmra.mxu2 %v2268_v1  ;;  %v2113_v1 = vld [vmem:[#allocation3 + $0x2c4] sm:$0xf]  ;;  %v2091_v19 = vld [vmem:[#allocation3 + $0x214] sm:$0xf] }
  0x6a   :  { %1066 = vmatpush.bf16.msrb.mxu2 %v1856_v20  ;;  %1032 = vmatmul.bf16.vlgmr.msra.gmra.mxu3 %v2286_v17  ;;  %v1829_v17 = vld [vmem:[#allocation3 + $0x348] sm:$0xf0]  ;;  %v1768_v54 = vor.u32 %v2113_v1, %v1765_v50  ;;  %v1677_v20 = vld [vmem:[#allocation3 + $0x218] sm:$0xf0]  ;;  %v2159_v1 = vld [vmem:[%s2428_s3 + $0x30] sm:$0xff] }
  0x6b   :  { %1080 = vmatpush.bf16.msrb.mxu3 %v1920_v23  ;;  %v1832_v10 = vor.u32 %v2129_v51, %v1829_v17  ;;  %v1741_v23 = vld [vmem:[#allocation3 + $0x298] sm:$0xf0]  ;;  %v2155_v50 = vld [vmem:[%s2428_s3 + $0x10] sm:$0xff]  ;;  %v2154_v17 = vld [vmem:[%s2428_s3 + $0x8] sm:$0xff] }
  0x6c   :  { %1039 = vmatpush.bf16.msrb.mxu0 %v1720_v28  ;;  %v1680_v28 = vor.u32 %v2091_v19, %v1677_v20  ;;  %v2167_v20 = vld [vmem:[%s2428_s3 + $0x70] sm:$0xff] }
  0x6d   :  { %1053 = vmatpush.bf16.msrb.mxu1 %v1784_v29  ;;  %v1744_v29 = vor.u32 %v2107_v21, %v1741_v23 }
  0x6e   :  { %1067 = vmatpush.bf16.msrb.mxu2 %v1848_v30  ;;  %v1808_v30 = vor.u32 %v2123_v24, %v1805_v25 }
  0x6f   :  { %1081 = vmatpush.bf16.msrb.mxu3 %v1912_v34  ;;  %v1872_v34 = vor.u32 %v2139_v26, %v1869_v27  ;;  %v2166_v27 = vld [vmem:[%s2428_s3 + $0x68] sm:$0xff] }
  0x70   :  { %1040 = vmatpush.bf16.msrb.mxu0 %v1712_v41  ;;  %v1672_v41 = vor.u32 %v2089_v31, %v1669_v32  ;;  %v2163_v31 = vld [vmem:[%s2428_s3 + $0x50] sm:$0xff] }
  0x71   :  { %1054 = vmatpush.bf16.msrb.mxu1 %v1776_v42  ;;  %v1736_v42 = vor.u32 %v2105_v33, %v1733_v35  ;;  %v2162_v33 = vld [vmem:[%s2428_s3 + $0x48] sm:$0xff] }
  0x72   :  { %1068 = vmatpush.bf16.msrb.mxu2 %v1840_v45  ;;  %v1800_v45 = vor.u32 %v2121_v36, %v1797_v37  ;;  %v2161_v36 = vld [vmem:[%s2428_s3 + $0x40] sm:$0xff] }
  0x73   :  { %1082 = vmatpush.bf16.msrb.mxu3 %v1904_v49 }
  0x74   :  { %1041 = vmatpush.bf16.msrb.mxu0 %v1704_v58 }
  0x75   :  { %1055 = vmatpush.bf16.msrb.mxu1 %v1768_v54 }
  0x76   :  { %1069 = vmatpush.bf16.msrb.mxu2 %v1832_v10  ;;  %v2153_v10 = vld [vmem:[%s2428_s3] sm:$0xff] }
  0x77   :  { %1083 = vmatpush.bf16.msrb.mxu3 %v1896_v59 }
  0x78   :  { %1042 = vmatpush.bf16.msrb.mxu0 %v1696_v2 }
  0x79   :  { %1056 = vmatpush.bf16.msrb.mxu1 %v1760_v3 }
  0x7a   :  { %1070 = vmatpush.bf16.msrb.mxu2 %v1824_v4 }
  0x7b   :  { %1084 = vmatpush.bf16.msrb.mxu3 %v1888_v8 }
  0x7c   :  { %1043 = vmatpush.bf16.msrb.mxu0 %v1688_v15 }
  0x7d   :  { %1057 = vmatpush.bf16.msrb.mxu1 %v1752_v16  ;;  %v2168_v16 = vld [vmem:[%s2428_s3 + $0x78] sm:$0xff] }
  0x7e   :  { %1071 = vmatpush.bf16.msrb.mxu2 %v1816_v18 }
  0x7f   :  { %1085 = vmatpush.bf16.msrb.mxu3 %v1880_v22 }
  0x80   :  { %1044 = vmatpush.bf16.msrb.mxu0 %v1680_v28  ;;  %v2165_v28 = vld [vmem:[%s2428_s3 + $0x60] sm:$0xff] }
  0x81   :  { %1058 = vmatpush.bf16.msrb.mxu1 %v1744_v29  ;;  %v2164_v29 = vld [vmem:[%s2428_s3 + $0x58] sm:$0xff] }
  0x82   :  { %1072 = vmatpush.bf16.msrb.mxu2 %v1808_v30 }
  0x83   :  { %1086 = vmatpush.bf16.msrb.mxu3 %v1872_v34 }
  0x84   :  { %1045 = vmatpush.bf16.msrb.mxu0 %v1672_v41 }
  0x85   :  { %1059 = vmatpush.bf16.msrb.mxu1 %v1736_v42 }
  0x86   :  { %1073 = vmatpush.bf16.msrb.mxu2 %v1800_v45 }
  0x87   :  { %1087 = vmatpush.bf16.msrb.mxu3 %v1864_v46  ;;  %1046 = vmatmul.bf16.vlgmr.msrb.gmra.mxu0 %v2314_v39  ;;  %v2158_v39 = vld [vmem:[%s2428_s3 + $0x28] sm:$0xff] }
  0x88   :  { %1060 = vmatmul.bf16.vlgmr.msrb.gmra.mxu1 %v2318_v44  ;;  %1257 = vmatpush.bf16.msra.mxu0 %v2160_v48  ;;  %v2156_v44 = vld [vmem:[%s2428_s3 + $0x18] sm:$0xff] }
  0x89   :  { %1074 = vmatmul.bf16.vlgmr.msrb.gmra.mxu2 %v2316_v43  ;;  %v2157_v43 = vld [vmem:[%s2428_s3 + $0x20] sm:$0xff]  ;;  %1271 = vmatpush.bf16.msra.mxu1 %v2168_v16 }
  0x8a   :  { %1088 = vmatmul.bf16.vlgmr.msrb.gmra.mxu3 %v2320_v47 }
  0x8c   :  { %1258 = vmatpush.bf16.msra.mxu0 %v2159_v1 }
  0x8d   :  { %1272 = vmatpush.bf16.msra.mxu1 %v2167_v20 }
  0x90   :  { %1259 = vmatpush.bf16.msra.mxu0 %v2158_v39 }
  0x91   :  { %1273 = vmatpush.bf16.msra.mxu1 %v2166_v27 }
  0x94   :  { %1260 = vmatpush.bf16.msra.mxu0 %v2157_v43 }
  0x95   :  { %1274 = vmatpush.bf16.msra.mxu1 %v2165_v28 }
  0x98   :  { %1261 = vmatpush.bf16.msra.mxu0 %v2156_v44 }
  0x99   :  { %1275 = vmatpush.bf16.msra.mxu1 %v2164_v29 }
  0x9c   :  { %1262 = vmatpush.bf16.msra.mxu0 %v2155_v50 }
  0x9d   :  { %1276 = vmatpush.bf16.msra.mxu1 %v2163_v31 }
  0xa0   :  { %1263 = vmatpush.bf16.msra.mxu0 %v2154_v17 }
  0xa1   :  { %1277 = vmatpush.bf16.msra.mxu1 %v2162_v33 }
  0xa4   :  { %v879_v47 = vpop.f32.mrf.mxu0  ;;  %1264 = vmatpush.bf16.msra.mxu0 %v2153_v10  ;;  %v1112_v10 = vperm.slane %v2361_v9, 1  ;;  %v2170_v9 = vld [vmem:[%s2430_s5 + $0x8] sm:$0xff] }
  0xa5   :  { %v893_v49 = vpop.f32.mrf.mxu1  ;;  %1278 = vmatpush.bf16.msra.mxu1 %v2161_v36 }
  0xa6   :  { %v894_v53 = vadd.f32 %v893_v49, %v879_v47 }
  0xac   :  { %v907_v51 = vpop.f32.mrf.mxu2  ;;  %v881_v58 = vpop.f32.mrf.mxu0 }
  0xad   :  { %v921_v52 = vpop.f32.mrf.mxu3  ;;  %v895_v54 = vpop.f32.mrf.mxu1  ;;  %v908_v55 = vadd.f32 %v907_v51, %v894_v53 }
  0xae   :  { %v896_v60 = vadd.f32 %v895_v54, %v881_v58 }
  0xaf   :  { %v922_v57 = vadd.f32 %v921_v52, %v908_v55 }
  0xb4   :  { %v909_v56 = vpop.f32.mrf.mxu2 }
  0xb5   :  { %v923_v59 = vpop.f32.mrf.mxu3  ;;  %v910_v0 = vadd.f32 %v909_v56, %v896_v60 }
  0xb7   :  { %v924_v4 = vadd.f32 %v923_v59, %v910_v0 }
  0xc4   :  { %v935_v61 = vpop.f32.mrf.mxu0 }
  0xc5   :  { %v949_v62 = vpop.f32.mrf.mxu1  ;;  %v936_v63 = vadd.f32 %v935_v61, %v922_v57 }
  0xc7   :  { %v950_v2 = vadd.f32 %v949_v62, %v936_v63 }
  0xcc   :  { %v963_v3 = vpop.f32.mrf.mxu2  ;;  %v937_v5 = vpop.f32.mrf.mxu0 }
  0xcd   :  { %v977_v6 = vpop.f32.mrf.mxu3  ;;  %v964_v7 = vadd.f32 %v963_v3, %v950_v2  ;;  %v938_v8 = vadd.f32 %v937_v5, %v924_v4  ;;  %v951_v11 = vpop.f32.mrf.mxu1  ;;  %v2176_v3 = vld [vmem:[%s2430_s5 + $0x38] sm:$0xff]  ;;  %v2175_v4 = vld [vmem:[%s2430_s5 + $0x30] sm:$0xff]  ;;  %v2174_v5 = vld [vmem:[%s2430_s5 + $0x28] sm:$0xff] }
  0xce   :  { %1356 = vmatpush.bf16.msra.mxu2 %v2176_v3 }
  0xcf   :  { %v978_v12 = vadd.f32 %v977_v6, %v964_v7  ;;  %v952_v14 = vadd.f32 %v951_v11, %v938_v8  ;;  %v2173_v6 = vld [vmem:[%s2430_s5 + $0x20] sm:$0xff]  ;;  %v2172_v7 = vld [vmem:[%s2430_s5 + $0x18] sm:$0xff]  ;;  %v2171_v8 = vld [vmem:[%s2430_s5 + $0x10] sm:$0xff] }
  0xd0   :  { %v2169_v11 = vld [vmem:[%s2430_s5] sm:$0xff] }
  0xd1   :  { %v1115_v21 = vadd.f32 %v1111_v13, %v978_v12 }
  0xd2   :  { %1357 = vmatpush.bf16.msra.mxu2 %v2175_v4 }
  0xd3   :  { %v1119_v24 = vmax.f32 %v1115_v21, 0.0 }
  0xd4   :  { %v965_v15 = vpop.f32.mrf.mxu2 }
  0xd5   :  { %v966_v18 = vadd.f32 %v965_v15, %v952_v14  ;;  %v979_v19 = vpop.f32.mrf.mxu3  ;;  %v2180_v14 = vld [vmem:[%s2429_s4] ss:$0 sm:$0xff] }
  0xd6   :  { %1358 = vmatpush.bf16.msra.mxu2 %v2174_v5 }
  0xd7   :  { %v980_v22 = vadd.f32 %v979_v19, %v966_v18 }
  0xd9   :  { %v1117_v23 = vadd.f32 %v1111_v13, %v980_v22 }
  0xda   :  { %1359 = vmatpush.bf16.msra.mxu2 %v2173_v6 }
  0xdb   :  { %v1121_v25 = vmax.f32 %v1117_v23, 0.0 }
  0xdd   :  { %v1123_v26 = vpack.c.bf16 %v1121_v25, %v1119_v24  ;;  %v2181_v25 = vld [vmem:[%s2431_s6] ss:$0 sm:$0xff] }
  0xde   :  { %1360 = vmatpush.bf16.msra.mxu2 %v2172_v7 }
  0xdf   :  { %1265 = vmatmul.bf16.vlgmr.msra.gmra.mxu0 %v1123_v26 }
  0xe2   :  { %1361 = vmatpush.bf16.msra.mxu2 %v2171_v8 }
  0xe4   :  { %v991_v30 = vpop.f32.mrf.mxu0 }
  0xe5   :  { %v1005_v32 = vpop.f32.mrf.mxu1 }
  0xe6   :  { %v1006_v38 = vadd.f32 %v1005_v32, %v991_v30  ;;  %1362 = vmatpush.bf16.msra.mxu2 %v2170_v9 }
  0xea   :  { %1363 = vmatpush.bf16.msra.mxu2 %v2169_v11 }
  0xec   :  { %v1019_v34 = vpop.f32.mrf.mxu2  ;;  %v993_v37 = vpop.f32.mrf.mxu0 }
  0xed   :  { %v1033_v35 = vpop.f32.mrf.mxu3  ;;  %v1007_v40 = vpop.f32.mrf.mxu1  ;;  %v1020_v41 = vadd.f32 %v1019_v34, %v1006_v38 }
  0xee   :  { %v1008_v45 = vadd.f32 %v1007_v40, %v993_v37 }
  0xef   :  { %v1034_v1 = vadd.f32 %v1033_v35, %v1020_v41 }
  0xf4   :  { %v1021_v42 = vpop.f32.mrf.mxu2 }
  0xf5   :  { %v1035_v46 = vpop.f32.mrf.mxu3  ;;  %v1022_v43 = vadd.f32 %v1021_v42, %v1008_v45 }
  0xf7   :  { %v1036_v49 = vadd.f32 %v1035_v46, %v1022_v43 }
 0x104   :  { %v1047_v48 = vpop.f32.mrf.mxu0 }
 0x105   :  { %v1061_v39 = vpop.f32.mrf.mxu1  ;;  %v1048_v44 = vadd.f32 %v1047_v48, %v1034_v1 }
 0x107   :  { %v1062_v50 = vadd.f32 %v1061_v39, %v1048_v44 }
 0x10c   :  { %v1075_v47 = vpop.f32.mrf.mxu2  ;;  %v1049_v17 = vpop.f32.mrf.mxu0 }
 0x10d   :  { %v1089_v51 = vpop.f32.mrf.mxu3  ;;  %v1076_v52 = vadd.f32 %v1075_v47, %v1062_v50  ;;  %v1050_v53 = vadd.f32 %v1049_v17, %v1036_v49  ;;  %v1063_v58 = vpop.f32.mrf.mxu1 }
 0x10f   :  { %v1090_v54 = vadd.f32 %v1089_v51, %v1076_v52  ;;  %v1064_v55 = vadd.f32 %v1063_v58, %v1050_v53 }
 0x111   :  { %v1116_v60 = vadd.f32 %v1112_v10, %v1090_v54 }
 0x113   :  { %v1120_v63 = vmax.f32 %v1116_v60, 0.0 }
 0x114   :  { %v1077_v56 = vpop.f32.mrf.mxu2 }
 0x115   :  { %v1078_v57 = vadd.f32 %v1077_v56, %v1064_v55  ;;  %v1091_v59 = vpop.f32.mrf.mxu3 }
 0x117   :  { %v1092_v61 = vadd.f32 %v1091_v59, %v1078_v57 }
 0x119   :  { %v1118_v62 = vadd.f32 %v1112_v10, %v1092_v61 }
 0x11b   :  { %v1122_v0 = vmax.f32 %v1118_v62, 0.0 }
 0x11d   :  { %v1124_v2 = vpack.c.bf16 %v1122_v0, %v1120_v63 }
 0x11f   :  { %1279 = vmatmul.bf16.vlgmr.msra.gmra.mxu1 %v1124_v2 }
 0x15c   :  { %v1266_v12 = vpop.f32.mrf.mxu0 }
 0x15d   :  { %v1267_v16 = vadd.f32 %v2180_v14, %v1266_v12 }
 0x164   :  { %v1268_v15 = vpop.f32.mrf.mxu0 }
 0x165   :  { %v1269_v18 = vadd.f32 %v2180_v14, %v1268_v15 }
 0x19c   :  { %v1280_v13 = vpop.f32.mrf.mxu1 }
 0x19d   :  { %v1281_v19 = vadd.f32 %v1280_v13, %v1267_v16 }
 0x19f   :  { %v1285_v22 = vmax.f32 %v1281_v19, 0.0 }
 0x1a4   :  { %v1282_v20 = vpop.f32.mrf.mxu1 }
 0x1a5   :  { %v1283_v21 = vadd.f32 %v1282_v20, %v1269_v18 }
 0x1a7   :  { %v1286_v23 = vmax.f32 %v1283_v21, 0.0 }
 0x1a9   :  { %v1287_v24 = vpack.c.bf16 %v1286_v23, %v1285_v22 }
 0x1ab   :  { %1364 = vmatmul.bf16.vlgmr.msra.gmra.mxu2 %v1287_v24 }
 0x22e   :  { %v1365_v26 = vpop.f32.mrf.mxu2 }
 0x22f   :  { %v1366_v27 = vadd.f32 %v2181_v25, %v1365_v26 }
 0x231   :  { %1370 = vst [vmem:[%s2432_s7] sm:$0xff] %v1366_v27 }
 0x236   :  { %v1367_v28 = vpop.f32.mrf.mxu2 }
 0x237   :  { %v1368_v29 = vadd.f32 %v2181_v25, %v1367_v28 }
 0x239   :  { %1371 = vst [vmem:[%s2432_s7 + $0x8] sm:$0xff] %v1368_v29 }
 0x23a   :  { %1376 = vsyncpa [#allocation4], 1 }

</bundles_post_ra>
